<compile_context>
chip_gen: v7x
topology: tpu7x:2x2x1
jax: 0.10.0
libtpu: 0.0.40
codegen_flags: <defaults>
</compile_context>

<pallas_src>
import jax
import jax.numpy as jnp
from jax.experimental import pallas as pl
from jax.experimental.pallas import tpu as pltpu


def _fused_passthrough_kernel(x_hbm, s_hbm, xo_hbm, so_hbm, sem):
    """Copy X and state HBM->HBM with two overlapped DMAs (no VMEM staging)."""
    cp_x = pltpu.make_async_copy(x_hbm, xo_hbm, sem.at[0])
    cp_s = pltpu.make_async_copy(s_hbm, so_hbm, sem.at[1])
    cp_x.start()
    cp_s.start()
    cp_x.wait()
    cp_s.wait()


@jax.jit
def _fused_passthrough(X, state):
    """Single fused pallas_call: (X, state) -> (X_copy, state_copy)."""
    return pl.pallas_call(
        _fused_passthrough_kernel,
        out_shape=(
            jax.ShapeDtypeStruct(X.shape, X.dtype),
            jax.ShapeDtypeStruct(state.shape, state.dtype),
        ),
        in_specs=[
            pl.BlockSpec(memory_space=pl.ANY),   # X stays in HBM
            pl.BlockSpec(memory_space=pl.ANY),   # state stays in HBM
        ],
        out_specs=(
            pl.BlockSpec(memory_space=pl.ANY),
            pl.BlockSpec(memory_space=pl.ANY),
        ),
        scratch_shapes=[pltpu.SemaphoreType.DMA((2,))],
    )(X, state)


class Decoder:
    """JAX/Pallas mirror of the abstract PyTorch `Decoder` base class."""

    def __init__(self, **kwargs):
        # Base class registers no parameters (matches nn.Module.__init__).
        del kwargs

    def init_state(self, enc_outputs, *args):
        raise NotImplementedError

    def forward(self, X, state):
        raise NotImplementedError

    # Concrete Pallas-backed pass-through used to exercise the (X, state)
    # call contract of the abstract interface on TPU.
    def _forward_identity(self, X, state):
        return _fused_passthrough(X, state)


if __name__ == "__main__":
    key = jax.random.PRNGKey(0)
    kx, ks = jax.random.split(key)

    batch, seq, hidden = 2, 8, 32
    X = jax.random.normal(kx, (batch, seq, hidden), dtype=jnp.float32)
    state = jax.random.normal(ks, (batch, hidden), dtype=jnp.float32)

    dec = Decoder()

    # The abstract contract: forward / init_state must raise.
    for fn, args in ((dec.forward, (X, state)), (dec.init_state, (X,))):
        try:
            fn(*args)
            raise AssertionError("abstract method did not raise")
        except NotImplementedError:
            pass

    # Pallas-backed pass-through exercising the (X, state) interface on TPU.
    x_out, state_out = dec._forward_identity(X, state)
    jax.block_until_ready((x_out, state_out))

    assert x_out.shape == X.shape and state_out.shape == state.shape
    assert jnp.allclose(x_out, X) and jnp.allclose(state_out, state)
    print("KERNEL_OK")
</pallas_src>

<mosaic_0001>
module attributes {stable_mosaic.version = 11 : i64} {
  func.func @_fused_passthrough_kernel(%arg0: memref<2x8x32xf32, #tpu.memory_space<any>>, %arg1: memref<2x32xf32, #tpu.memory_space<any>>, %arg2: memref<2x8x32xf32, #tpu.memory_space<any>>, %arg3: memref<2x32xf32, #tpu.memory_space<any>>, %arg4: memref<2x!tpu.dma_semaphore, #tpu.memory_space<semaphore_mem>>) attributes {dimension_semantics = [], scalar_prefetch = 0 : i64, scratch_operands = 1 : i64, tpu.core_type = #tpu.core_type<tc>} {
    %c0_i32 = arith.constant 0 : i32
    %0 = tpu.memref_slice %arg4[%c0_i32] : memref<2x!tpu.dma_semaphore, #tpu.memory_space<semaphore_mem>> -> memref<1x!tpu.dma_semaphore, #tpu.memory_space<semaphore_mem>>
    %1 = tpu.memref_squeeze %0 : memref<1x!tpu.dma_semaphore, #tpu.memory_space<semaphore_mem>> -> memref<!tpu.dma_semaphore, #tpu.memory_space<semaphore_mem>>
    tpu.enqueue_dma source(%arg0 : memref<2x8x32xf32, #tpu.memory_space<any>>) target(%arg2 : memref<2x8x32xf32, #tpu.memory_space<any>>) target_semaphore(%1 : memref<!tpu.dma_semaphore, #tpu.memory_space<semaphore_mem>>)
    %c1_i32 = arith.constant 1 : i32
    %2 = tpu.memref_slice %arg4[%c1_i32] : memref<2x!tpu.dma_semaphore, #tpu.memory_space<semaphore_mem>> -> memref<1x!tpu.dma_semaphore, #tpu.memory_space<semaphore_mem>>
    %3 = tpu.memref_squeeze %2 : memref<1x!tpu.dma_semaphore, #tpu.memory_space<semaphore_mem>> -> memref<!tpu.dma_semaphore, #tpu.memory_space<semaphore_mem>>
    tpu.enqueue_dma source(%arg1 : memref<2x32xf32, #tpu.memory_space<any>>) target(%arg3 : memref<2x32xf32, #tpu.memory_space<any>>) target_semaphore(%3 : memref<!tpu.dma_semaphore, #tpu.memory_space<semaphore_mem>>)
    %c0_i32_0 = arith.constant 0 : i32
    %4 = tpu.memref_slice %arg4[%c0_i32_0] : memref<2x!tpu.dma_semaphore, #tpu.memory_space<semaphore_mem>> -> memref<1x!tpu.dma_semaphore, #tpu.memory_space<semaphore_mem>>
    %5 = tpu.memref_squeeze %4 : memref<1x!tpu.dma_semaphore, #tpu.memory_space<semaphore_mem>> -> memref<!tpu.dma_semaphore, #tpu.memory_space<semaphore_mem>>
    tpu.wait_dma2 semaphore(%5 : memref<!tpu.dma_semaphore, #tpu.memory_space<semaphore_mem>>) src(%arg0 : memref<2x8x32xf32, #tpu.memory_space<any>>) dst(%arg2 : memref<2x8x32xf32, #tpu.memory_space<any>>)
    %c1_i32_1 = arith.constant 1 : i32
    %6 = tpu.memref_slice %arg4[%c1_i32_1] : memref<2x!tpu.dma_semaphore, #tpu.memory_space<semaphore_mem>> -> memref<1x!tpu.dma_semaphore, #tpu.memory_space<semaphore_mem>>
    %7 = tpu.memref_squeeze %6 : memref<1x!tpu.dma_semaphore, #tpu.memory_space<semaphore_mem>> -> memref<!tpu.dma_semaphore, #tpu.memory_space<semaphore_mem>>
    tpu.wait_dma2 semaphore(%7 : memref<!tpu.dma_semaphore, #tpu.memory_space<semaphore_mem>>) src(%arg1 : memref<2x32xf32, #tpu.memory_space<any>>) dst(%arg3 : memref<2x32xf32, #tpu.memory_space<any>>)
    return
  }
}

</mosaic_0001>

<bundles_post_ra>
// kernel: _fused_passthrough.1
= control target key start
LH: loop header
LB: loop body
LE: loop exit
PB: predicated region body
PF: predicated region fallthrough
CT: control target
= control target key end

     0   :  { %s85_s15 = smov [#allocation2]   ;;  %s86_s16 = smov [#allocation3]   ;;  %s129_s0 = inlined_call_operand.hbm [shape: f32[2,8,32], index: 0, kind: input, shape index: {}]   ;;  %s130_s2 = inlined_call_operand.hbm [shape: f32[2,8,32], index: 2, kind: output, shape index: {0}]   ;;  %s131_s1 = inlined_call_operand.vmem [shape: f32[2,32], index: 1, kind: input, shape index: {}]   ;;  %s132_s3 = inlined_call_operand.hbm [shape: f32[2,32], index: 3, kind: output, shape index: {1}]  }
   0x1   :  { %s30_s14 = sshll.u32 %s131_s1, 4  ;;  %s87_s17 = smov 0   ;;  %s31_s14 = int_to_ptr.vmem [resolvable:$true] %s30_s14 }
   0x2   :  { %21 = dma.general %s129_s0, 256, %s130_s2, %s85_s15, %s86_s16, [#allocation4], %s87_s17, 0  }
   0x3   :  { %s59_s22 = scalar_lea.vmem %s31_s14, 32  ;;  %p64_p1 = scmp.lt.s32.totalorder %s31_s14, %s31_s14 }
   0x4   :  { %p60_p0 = scmp.ne.s32.totalorder %s31_s14, %s59_s22  ;;  %p65_p2 = scmp.lt.s32.totalorder %s59_s22, %s59_s22 }
   0x6   :  { %p66_p3 = por %p65_p2, %p64_p1 }
   0x8   :  { %p67_p4 = pnand %p66_p3, %p60_p0 }
   0xa   :  { %70 = shalt.err (!%p67_p4)  }
   0xb   :  { %s71_s24 = scalar_lea.hbm %s132_s3, 32 }
   0xc   :  { %p72_p5 = scmp.ne.s32.totalorder %s132_s3, %s71_s24  ;;  %p75_p6 = scmp.lt.u32.totalorder %s71_s24, %s132_s3 }
   0xe   :  { %p77_p7 = pnand %p75_p6, %p72_p5 }
  0x10   :  { %80 = shalt.err (!%p77_p7)  }
  0x11   :  { %33 = dma.vmem_to_hbm [thread:$0]  %s31_s14, 32, %s132_s3, [#allocation2 + $0x1] }
  0x12   :  { %81 = dma.done.wait [#allocation2], 256 }
  0x13   :  { %82 = vsyncadd [#allocation2], 4294967040 }
  0x14   :  { %83 = dma.done.wait [#allocation2 + $0x1], 32 }
  0x15   :  { %84 = vsyncadd [#allocation2 + $0x1], 4294967264 }
  0x16   :  { %41 = vsyncmov [#allocation2] }
  0x19   :  { %s42_s29 = vpop.sfrf %41 }
  0x1a   :  { %p54_p8 = scmp.ne.s32.totalorder %s42_s29, 0 }
  0x1c   :  { %46 = shalt.err (%p54_p8)  }
  0x1d   :  { %48 = vsyncmov [#allocation2 + $0x1] }
  0x20   :  { %s49_s30 = vpop.sfrf %48 }
  0x21   :  { %p55_p9 = scmp.ne.s32.totalorder %s49_s30, 0 }
  0x23   :  { %53 = shalt.err (%p55_p9)  }

</bundles_post_ra>
